<compile_context>
chip_gen: v7x
topology: tpu7x:2x2x1
jax: 0.10.0
libtpu: 0.0.40
codegen_flags: <defaults>
</compile_context>

<pallas_src>
import functools

import jax
import jax.numpy as jnp
from jax.experimental import pallas as pl
from jax.experimental.pallas import tpu as pltpu

_NEG_BIG = -1e30  # "-inf" stand-in that stays finite under arithmetic
_MIB = 1024 * 1024


def _tile_update(z, is_target, num_ref, m_ref, l_ref):
    """Online log-sum-exp + numerator accumulation for one (tn, tc) logit tile."""
    num_ref[...] += jnp.sum(jnp.where(is_target, z, 0.0), axis=1, keepdims=True)
    m_prev = m_ref[...]
    m_new = jnp.maximum(m_prev, jnp.max(z, axis=1, keepdims=True))
    l_ref[...] = (l_ref[...] * jnp.exp(m_prev - m_new)
                  + jnp.sum(jnp.exp(z - m_new), axis=1, keepdims=True))
    m_ref[...] = m_new


def _admsoftmax_kernel(x_ref, w_ref, labels_ref, out_ref,
                       xn_ref, m_ref, l_ref, num_ref,
                       *, s, m, num_classes, c_tile, needs_mask):
    # x_ref:      (tn, E)  input features tile (resident across the C axis)
    # w_ref:      (tc, E)  weight rows tile (streamed / double-buffered)
    # labels_ref: (tn, 1)  int32 labels tile
    # out_ref:    (tn, 1)  per-row L_i (written only on the last C tile)
    # xn_ref:     (tn, E)  scratch in the matmul compute dtype: normalized x
    # m_ref/l_ref/num_ref: (tn, 1) f32 scratch: online-LSE max / sum and the
    #                      margin-adjusted target logit (= numerator_i)
    c_idx = pl.program_id(1)
    n_c = pl.num_programs(1)

    @pl.when(c_idx == 0)
    def _init():
        # F.normalize(x, dim=1): x / max(||x||_2, eps), eps = 1e-12 (f32 math)
        x = x_ref[...].astype(jnp.float32)
        norm = jnp.sqrt(jnp.sum(x * x, axis=1, keepdims=True))
        xn = x / jnp.maximum(norm, 1e-12)
        xn_ref[...] = xn.astype(xn_ref.dtype)          # cast ONCE per N tile
        m_ref[...] = jnp.full_like(m_ref, _NEG_BIG)
        l_ref[...] = jnp.zeros_like(l_ref)
        num_ref[...] = jnp.zeros_like(num_ref)

    # wf tile: (tn, tc) = x_n(tn,E) . W_tile(tc,E)^T  -- contract on E (MXU)
    wf = jax.lax.dot_general(
        xn_ref[...], w_ref[...],
        dimension_numbers=(((1,), (1,)), ((), ())),
        preferred_element_type=jnp.float32)                     # (tn, tc) f32

    labels = labels_ref[...]                                    # (tn, 1) int32
    col = c_idx * c_tile + jax.lax.broadcasted_iota(jnp.int32, wf.shape, 1)
    is_target = col == labels                                   # (tn, tc)

    # Margin-adjusted, scaled logits:
    #   z_ij = s*(wf_ij - m) for the target column, s*wf_ij otherwise.
    # Then L_i = z_i,label - logsumexp_j(z_ij) reproduces
    #   numerator - log(exp(numerator) + sum_{j != label} exp(s*wf_ij)).
    zs = s * wf
    z = jnp.where(is_target, zs - (s * m), zs)

    if needs_mask:
        # Padded class columns exist only in the final C tile: mask them there,
        # keep every other tile on the cheaper unmasked path.
        @pl.when(c_idx == n_c - 1)
        def _masked():
            zm = jnp.where(col < num_classes, z, _NEG_BIG)
            _tile_update(zm, is_target, num_ref, m_ref, l_ref)

        @pl.when(c_idx != n_c - 1)
        def _unmasked():
            _tile_update(z, is_target, num_ref, m_ref, l_ref)
    else:
        _tile_update(z, is_target, num_ref, m_ref, l_ref)

    @pl.when(c_idx == n_c - 1)
    def _finalize():
        out_ref[...] = num_ref[...] - (m_ref[...] + jnp.log(l_ref[...]))


def _vmem_capacity_bytes():
    """Per-core VMEM capacity; conservative (64 MiB) fallback if unknown."""
    try:
        info = pltpu.get_tpu_info()
        cap = getattr(info, "vmem_capacity_bytes", None)
        if cap:
            return int(cap)
    except Exception:
        pass
    return 64 * _MIB


def _round_tile(t, full):
    """Legal (8,*)-aligned tile size <= full; prefers 256 alignment when big."""
    if t >= full:
        return full
    if t >= 256:
        return (t // 256) * 256
    return max(8, (t // 8) * 8)


def _vmem_estimate(tn, tc, E, x_bytes, w_bytes, cmp_bytes):
    return (2 * tn * E * x_bytes        # x tile (double-buffered)
            + 2 * tc * E * w_bytes      # weight tile (double-buffered)
            + tn * E * cmp_bytes        # normalized-x scratch
            + 4 * tn * 4                # labels + out (double-buffered)
            + 3 * tn * 4                # m / l / num scratch
            + 4 * tn * tc * 4           # wf / z / exp f32 temporaries
            + 2 * _MIB)                 # Mosaic internal scratch headroom


def admsoftmax_loss(x, weights, labels, *, s=30.0, m=0.4,
                    n_tile=None, c_tile=None, compute_dtype=None):
    """x: (N, E), weights: (C, E) (nn.Linear weight layout), labels: (N,) int.

    compute_dtype: optional dtype for the MXU operand stream (e.g. jnp.bfloat16
    to halve weight HBM traffic); accumulation and softmax math stay f32.
    """
    # TODO(synk): the PyTorch module's runtime asserts on `labels` (range
    # checks) have no in-kernel equivalent; labels are assumed valid here.
    N, E = x.shape
    C = weights.shape[0]
    labels2d = labels.astype(jnp.int32).reshape(N, 1)

    if compute_dtype is not None:
        weights = weights.astype(compute_dtype)     # cast once in the wrapper
    cmp_dtype = weights.dtype                       # matmul operand dtype

    x_bytes = jnp.dtype(x.dtype).itemsize
    w_bytes = jnp.dtype(weights.dtype).itemsize
    cmp_bytes = jnp.dtype(cmp_dtype).itemsize

    # ---- generation-aware budgets -------------------------------------------
    vmem_cap = _vmem_capacity_bytes()
    small_vmem = vmem_cap <= 64 * _MIB              # v7x-class part (2 TCs)
    if small_vmem:
        w_tile_budget = 8 * _MIB                    # double-buffered W pair
        vmem_limit_cap = 40 * _MIB
        tc_max, tn_cap = 2048, 512
    else:
        w_tile_budget = 24 * _MIB
        vmem_limit_cap = 96 * _MIB
        tc_max, tn_cap = 4096, 1024

    # ---- class-axis tile -----------------------------------------------------
    if c_tile is not None:
        tc = min(c_tile, C)
    elif C <= 512:
        tc = C
    else:
        tc = w_tile_budget // max(2 * E * w_bytes, 1)
        tc = max(128, (tc // 128) * 128)            # 128-granular (MXU-native)
        tc = min(tc, tc_max, C)
    if tc < C and tc % 8 != 0:
        tc = max(8, (tc // 8) * 8)

    # ---- batch-axis tile: as large as the VMEM budget allows -----------------
    if n_tile is not None:
        tn = _round_tile(min(n_tile, N), N)
    else:
        tn = _round_tile(min(tn_cap, N), N)
        while (tn > 8
               and _vmem_estimate(tn, tc, E, x_bytes, w_bytes, cmp_bytes)
               > 0.8 * vmem_limit_cap):
            tn = _round_tile(max(tn // 2, 8), N)
        # On 2-TC parts only the "parallel" axis shards across cores: make sure
        # the N axis has >= 2 programs (no extra W traffic: each N tile streams
        # W once regardless).
        if small_vmem and N > 8 and pl.cdiv(N, tn) == 1:
            tn = max(8, ((-(-N // 2) + 7) // 8) * 8)

    grid = (pl.cdiv(N, tn), pl.cdiv(C, tc))
    needs_mask = (C % tc) != 0

    est = _vmem_estimate(tn, tc, E, x_bytes, w_bytes, cmp_bytes)
    vmem_limit = int(min(max(int(1.25 * est), 16 * _MIB), vmem_limit_cap))

    out = pl.pallas_call(
        functools.partial(_admsoftmax_kernel, s=float(s), m=float(m),
                          num_classes=C, c_tile=tc, needs_mask=needs_mask),
        out_shape=jax.ShapeDtypeStruct((N, 1), jnp.float32),
        grid_spec=pltpu.PrefetchScalarGridSpec(
            num_scalar_prefetch=0,
            grid=grid,
            in_specs=[
                pl.BlockSpec((tn, E), lambda n, c: (n, 0)),   # x
                pl.BlockSpec((tc, E), lambda n, c: (c, 0)),   # W rows (no .T)
                pl.BlockSpec((tn, 1), lambda n, c: (n, 0)),   # labels
            ],
            out_specs=pl.BlockSpec((tn, 1), lambda n, c: (n, 0)),
            scratch_shapes=[
                pltpu.VMEM((tn, E), cmp_dtype),    # normalized x (compute dtype)
                pltpu.VMEM((tn, 1), jnp.float32),  # running max
                pltpu.VMEM((tn, 1), jnp.float32),  # running sum
                pltpu.VMEM((tn, 1), jnp.float32),  # numerator (target logit)
            ]),
        compiler_params=pltpu.CompilerParams(
            dimension_semantics=("parallel", "arbitrary"),
            vmem_limit_bytes=vmem_limit),
    )(x, weights, labels2d)

    # cheap final reduction in plain JAX
    return -jnp.mean(out[:, 0])


def _reference(x, weights, labels, s=30.0, m=0.4):
    """Pure-JAX reference mirroring the PyTorch forward (incl. the weight-normalize no-op)."""
    norm = jnp.sqrt(jnp.sum(x * x, axis=1, keepdims=True))
    x_n = x / jnp.maximum(norm, 1e-12)
    wf = x_n @ weights.T
    N = x.shape[0]
    tgt = wf[jnp.arange(N), labels]
    numerator = s * (tgt - m)
    exp_all = jnp.exp(s * wf)
    one_hot = jax.nn.one_hot(labels, weights.shape[0], dtype=wf.dtype)
    sum_excl = jnp.sum(exp_all * (1.0 - one_hot), axis=1)
    denom = jnp.exp(numerator) + sum_excl
    L = numerator - jnp.log(denom)
    return -jnp.mean(L)


if __name__ == "__main__":
    # Small but tiling-exercising shapes: C=320 with c_tile=128 -> 3 class
    # tiles, last one half-padded (exercises the statically-gated pad mask and
    # the online LSE across tiles).
    N, E, C = 16, 64, 320
    s, m = 30.0, 0.4

    key = jax.random.PRNGKey(0)
    kx, kw, kl = jax.random.split(key, 3)

    x = jax.random.normal(kx, (N, E), dtype=jnp.float32)
    # deterministic "nn.Linear(embeddings, num_classes, bias=False)" weight: (C, E)
    bound = 1.0 / (E ** 0.5)
    weights = jax.random.uniform(kw, (C, E), dtype=jnp.float32,
                                 minval=-bound, maxval=bound)
    labels = jax.random.randint(kl, (N,), 0, C, dtype=jnp.int32)

    loss = admsoftmax_loss(x, weights, labels, s=s, m=m, c_tile=128)
    loss = jax.block_until_ready(loss)

    ref = _reference(x, weights, labels, s=s, m=m)
    assert jnp.allclose(loss, ref, rtol=1e-4, atol=1e-4), (loss, ref)

    print("KERNEL_OK")
</pallas_src>

<mosaic_0001>
module attributes {stable_mosaic.version = 11 : i64} {
  func.func @_admsoftmax_kernel(%arg0: i32, %arg1: i32, %arg2: memref<8x64xf32, #tpu.memory_space<vmem>>, %arg3: memref<128x64xf32, #tpu.memory_space<vmem>>, %arg4: memref<8x1xi32, #tpu.memory_space<vmem>>, %arg5: memref<8x1xf32, #tpu.memory_space<vmem>>, %arg6: memref<8x64xf32, #tpu.memory_space<vmem>>, %arg7: memref<8x1xf32, #tpu.memory_space<vmem>>, %arg8: memref<8x1xf32, #tpu.memory_space<vmem>>, %arg9: memref<8x1xf32, #tpu.memory_space<vmem>>) attributes {dimension_semantics = [#tpu.dimension_semantics<parallel>, #tpu.dimension_semantics<arbitrary>], iteration_bounds = array<i64: 2, 3>, scalar_prefetch = 0 : i64, scratch_operands = 4 : i64, tpu.core_type = #tpu.core_type<tc>, window_params = [{transform_indices = @transform_0, window_bounds = array<i64: 8, 64>}, {transform_indices = @transform_1, window_bounds = array<i64: 128, 64>}, {transform_indices = @transform_2, window_bounds = array<i64: 8, 1>}, {transform_indices = @transform_3, window_bounds = array<i64: 8, 1>}]} {
    %c0_i32 = arith.constant 0 : i32
    %0 = arith.cmpi eq, %arg1, %c0_i32 : i32
    %1 = arith.extui %0 : i1 to i32
    %c0_i32_0 = arith.constant 0 : i32
    %2 = arith.cmpi ne, %1, %c0_i32_0 : i32
    scf.if %2 {
      %c0_13 = arith.constant 0 : index
      %c0_14 = arith.constant 0 : index
      %27 = vector.load %arg2[%c0_13, %c0_14] : memref<8x64xf32, #tpu.memory_space<vmem>>, vector<8x64xf32>
      %28 = arith.mulf %27, %27 : vector<8x64xf32>
      %cst_15 = arith.constant dense<0.000000e+00> : vector<8xf32>
      %29 = vector.multi_reduction <add>, %28, %cst_15 [1] : vector<8x64xf32> to vector<8xf32>
      %30 = vector.shape_cast %29 : vector<8xf32> to vector<8x1xf32>
      %31 = math.sqrt %30 : vector<8x1xf32>
      %cst_16 = arith.constant 9.99999996E-13 : f32
      %32 = vector.broadcast %cst_16 : f32 to vector<8x1xf32>
      %33 = arith.maximumf %31, %32 : vector<8x1xf32>
      %34 = vector.broadcast %33 : vector<8x1xf32> to vector<8x64xf32>
      %35 = arith.divf %27, %34 : vector<8x64xf32>
      %c0_17 = arith.constant 0 : index
      %c0_18 = arith.constant 0 : index
      %36 = vector.load %arg6[%c0_17, %c0_18] : memref<8x64xf32, #tpu.memory_space<vmem>>, vector<8x64xf32>
      tpu.vector_store %arg6[%c0_17, %c0_18], %35 {strides = array<i32>} : memref<8x64xf32, #tpu.memory_space<vmem>>, vector<8x64xf32>,
      %cst_19 = arith.constant -1.000000e+30 : f32
      %37 = vector.broadcast %cst_19 : f32 to vector<8x1xf32>
      %c0_20 = arith.constant 0 : index
      %c0_21 = arith.constant 0 : index
      %38 = vector.load %arg7[%c0_20, %c0_21] : memref<8x1xf32, #tpu.memory_space<vmem>>, vector<8x1xf32>
      tpu.vector_store %arg7[%c0_20, %c0_21], %37 {strides = array<i32>} : memref<8x1xf32, #tpu.memory_space<vmem>>, vector<8x1xf32>,
      %cst_22 = arith.constant 0.000000e+00 : f32
      %39 = vector.broadcast %cst_22 : f32 to vector<8x1xf32>
      %c0_23 = arith.constant 0 : index
      %c0_24 = arith.constant 0 : index
      %40 = vector.load %arg8[%c0_23, %c0_24] : memref<8x1xf32, #tpu.memory_space<vmem>>, vector<8x1xf32>
      tpu.vector_store %arg8[%c0_23, %c0_24], %39 {strides = array<i32>} : memref<8x1xf32, #tpu.memory_space<vmem>>, vector<8x1xf32>,
      %cst_25 = arith.constant 0.000000e+00 : f32
      %41 = vector.broadcast %cst_25 : f32 to vector<8x1xf32>
      %c0_26 = arith.constant 0 : index
      %c0_27 = arith.constant 0 : index
      %42 = vector.load %arg9[%c0_26, %c0_27] : memref<8x1xf32, #tpu.memory_space<vmem>>, vector<8x1xf32>
      tpu.vector_store %arg9[%c0_26, %c0_27], %41 {strides = array<i32>} : memref<8x1xf32, #tpu.memory_space<vmem>>, vector<8x1xf32>,
    } else {
    }
    %c0 = arith.constant 0 : index
    %c0_1 = arith.constant 0 : index
    %3 = vector.load %arg6[%c0, %c0_1] : memref<8x64xf32, #tpu.memory_space<vmem>>, vector<8x64xf32>
    %c0_2 = arith.constant 0 : index
    %c0_3 = arith.constant 0 : index
    %4 = vector.load %arg3[%c0_2, %c0_3] : memref<128x64xf32, #tpu.memory_space<vmem>>, vector<128x64xf32>
    %cst = arith.constant dense<0.000000e+00> : vector<8x128xf32>
    %5 = tpu.matmul %3, %4, %cst {dimension_numbers = #tpu.dot_dimension_numbers<[1], [1], [0], [0], [0, 0, 1, 0], [], []>} : vector<8x64xf32>, vector<128x64xf32>, vector<8x128xf32> -> vector<8x128xf32>
    %c0_4 = arith.constant 0 : index
    %c0_5 = arith.constant 0 : index
    %6 = vector.load %arg4[%c0_4, %c0_5] : memref<8x1xi32, #tpu.memory_space<vmem>>, vector<8x1xi32>
    %c128_i32 = arith.constant 128 : i32
    %7 = arith.muli %arg1, %c128_i32 : i32
    %8 = tpu.iota {dimensions = array<i32: 1>} : vector<8x128xi32>
    %9 = vector.broadcast %7 : i32 to vector<8x128xi32>
    %10 = arith.addi %9, %8 : vector<8x128xi32>
    %11 = vector.broadcast %6 : vector<8x1xi32> to vector<8x128xi32>
    %12 = arith.cmpi eq, %10, %11 : vector<8x128xi32>
    %cst_6 = arith.constant 3.000000e+01 : f32
    %13 = vector.broadcast %cst_6 : f32 to vector<8x128xf32>
    %14 = arith.mulf %13, %5 : vector<8x128xf32>
    %cst_7 = arith.constant 1.200000e+01 : f32
    %15 = vector.broadcast %cst_7 : f32 to vector<8x128xf32>
    %16 = arith.subf %14, %15 : vector<8x128xf32>
    %17 = arith.select %12, %16, %14 : vector<8x128xi1>, vector<8x128xf32>
    %c2_i32 = arith.constant 2 : i32
    %18 = arith.cmpi eq, %arg1, %c2_i32 : i32
    %19 = arith.extui %18 : i1 to i32
    %c0_i32_8 = arith.constant 0 : i32
    %20 = arith.cmpi ne, %19, %c0_i32_8 : i32
    scf.if %20 {
      %c320_i32 = arith.constant 320 : i32
      %27 = vector.broadcast %c320_i32 : i32 to vector<8x128xi32>
      %28 = arith.cmpi slt, %10, %27 : vector<8x128xi32>
      %cst_13 = arith.constant -1.000000e+30 : f32
      %29 = vector.broadcast %cst_13 : f32 to vector<8x128xf32>
      %30 = arith.select %28, %17, %29 : vector<8x128xi1>, vector<8x128xf32>
      %c0_14 = arith.constant 0 : index
      %c0_15 = arith.constant 0 : index
      %31 = vector.load %arg9[%c0_14, %c0_15] : memref<8x1xf32, #tpu.memory_space<vmem>>, vector<8x1xf32>
      %cst_16 = arith.constant 0.000000e+00 : f32
      %32 = vector.broadcast %cst_16 : f32 to vector<8x128xf32>
      %33 = arith.select %12, %30, %32 : vector<8x128xi1>, vector<8x128xf32>
      %cst_17 = arith.constant dense<0.000000e+00> : vector<8xf32>
      %34 = vector.multi_reduction <add>, %33, %cst_17 [1] : vector<8x128xf32> to vector<8xf32>
      %35 = vector.shape_cast %34 : vector<8xf32> to vector<8x1xf32>
      %36 = arith.addf %31, %35 : vector<8x1xf32>
      %c0_18 = arith.constant 0 : index
      %c0_19 = arith.constant 0 : index
      %37 = vector.load %arg9[%c0_18, %c0_19] : memref<8x1xf32, #tpu.memory_space<vmem>>, vector<8x1xf32>
      tpu.vector_store %arg9[%c0_18, %c0_19], %36 {strides = array<i32>} : memref<8x1xf32, #tpu.memory_space<vmem>>, vector<8x1xf32>,
      %c0_20 = arith.constant 0 : index
      %c0_21 = arith.constant 0 : index
      %38 = vector.load %arg7[%c0_20, %c0_21] : memref<8x1xf32, #tpu.memory_space<vmem>>, vector<8x1xf32>
      %cst_22 = arith.constant dense<0xFF800000> : vector<8xf32>
      %39 = vector.multi_reduction <maximumf>, %30, %cst_22 [1] : vector<8x128xf32> to vector<8xf32>
      %40 = vector.shape_cast %39 : vector<8xf32> to vector<8x1xf32>
      %41 = arith.maximumf %38, %40 : vector<8x1xf32>
      %c0_23 = arith.constant 0 : index
      %c0_24 = arith.constant 0 : index
      %42 = vector.load %arg8[%c0_23, %c0_24] : memref<8x1xf32, #tpu.memory_space<vmem>>, vector<8x1xf32>
      %43 = arith.subf %38, %41 : vector<8x1xf32>
      %44 = math.exp %43 : vector<8x1xf32>
      %45 = arith.mulf %42, %44 : vector<8x1xf32>
      %46 = vector.broadcast %41 : vector<8x1xf32> to vector<8x128xf32>
      %47 = arith.subf %30, %46 : vector<8x128xf32>
      %48 = math.exp %47 : vector<8x128xf32>
      %cst_25 = arith.constant dense<0.000000e+00> : vector<8xf32>
      %49 = vector.multi_reduction <add>, %48, %cst_25 [1] : vector<8x128xf32> to vector<8xf32>
      %50 = vector.shape_cast %49 : vector<8xf32> to vector<8x1xf32>
      %51 = arith.addf %45, %50 : vector<8x1xf32>
      %c0_26 = arith.constant 0 : index
      %c0_27 = arith.constant 0 : index
      %52 = vector.load %arg8[%c0_26, %c0_27] : memref<8x1xf32, #tpu.memory_space<vmem>>, vector<8x1xf32>
      tpu.vector_store %arg8[%c0_26, %c0_27], %51 {strides = array<i32>} : memref<8x1xf32, #tpu.memory_space<vmem>>, vector<8x1xf32>,
      %c0_28 = arith.constant 0 : index
      %c0_29 = arith.constant 0 : index
      %53 = vector.load %arg7[%c0_28, %c0_29] : memref<8x1xf32, #tpu.memory_space<vmem>>, vector<8x1xf32>
      tpu.vector_store %arg7[%c0_28, %c0_29], %41 {strides = array<i32>} : memref<8x1xf32, #tpu.memory_space<vmem>>, vector<8x1xf32>,
    } else {
    }
    %c2_i32_9 = arith.constant 2 : i32
    %21 = arith.cmpi ne, %arg1, %c2_i32_9 : i32
    %22 = arith.extui %21 : i1 to i32
    %c0_i32_10 = arith.constant 0 : i32
    %23 = arith.cmpi ne, %22, %c0_i32_10 : i32
    scf.if %23 {
      %c0_13 = arith.constant 0 : index
      %c0_14 = arith.constant 0 : index
      %27 = vector.load %arg9[%c0_13, %c0_14] : memref<8x1xf32, #tpu.memory_space<vmem>>, vector<8x1xf32>
      %cst_15 = arith.constant 0.000000e+00 : f32
      %28 = vector.broadcast %cst_15 : f32 to vector<8x128xf32>
      %29 = arith.select %12, %17, %28 : vector<8x128xi1>, vector<8x128xf32>
      %cst_16 = arith.constant dense<0.000000e+00> : vector<8xf32>
      %30 = vector.multi_reduction <add>, %29, %cst_16 [1] : vector<8x128xf32> to vector<8xf32>
      %31 = vector.shape_cast %30 : vector<8xf32> to vector<8x1xf32>
      %32 = arith.addf %27, %31 : vector<8x1xf32>
      %c0_17 = arith.constant 0 : index
      %c0_18 = arith.constant 0 : index
      %33 = vector.load %arg9[%c0_17, %c0_18] : memref<8x1xf32, #tpu.memory_space<vmem>>, vector<8x1xf32>
      tpu.vector_store %arg9[%c0_17, %c0_18], %32 {strides = array<i32>} : memref<8x1xf32, #tpu.memory_space<vmem>>, vector<8x1xf32>,
      %c0_19 = arith.constant 0 : index
      %c0_20 = arith.constant 0 : index
      %34 = vector.load %arg7[%c0_19, %c0_20] : memref<8x1xf32, #tpu.memory_space<vmem>>, vector<8x1xf32>
      %cst_21 = arith.constant dense<0xFF800000> : vector<8xf32>
      %35 = vector.multi_reduction <maximumf>, %17, %cst_21 [1] : vector<8x128xf32> to vector<8xf32>
      %36 = vector.shape_cast %35 : vector<8xf32> to vector<8x1xf32>
      %37 = arith.maximumf %34, %36 : vector<8x1xf32>
      %c0_22 = arith.constant 0 : index
      %c0_23 = arith.constant 0 : index
      %38 = vector.load %arg8[%c0_22, %c0_23] : memref<8x1xf32, #tpu.memory_space<vmem>>, vector<8x1xf32>
      %39 = arith.subf %34, %37 : vector<8x1xf32>
      %40 = math.exp %39 : vector<8x1xf32>
      %41 = arith.mulf %38, %40 : vector<8x1xf32>
      %42 = vector.broadcast %37 : vector<8x1xf32> to vector<8x128xf32>
      %43 = arith.subf %17, %42 : vector<8x128xf32>
      %44 = math.exp %43 : vector<8x128xf32>
      %cst_24 = arith.constant dense<0.000000e+00> : vector<8xf32>
      %45 = vector.multi_reduction <add>, %44, %cst_24 [1] : vector<8x128xf32> to vector<8xf32>
      %46 = vector.shape_cast %45 : vector<8xf32> to vector<8x1xf32>
      %47 = arith.addf %41, %46 : vector<8x1xf32>
      %c0_25 = arith.constant 0 : index
      %c0_26 = arith.constant 0 : index
      %48 = vector.load %arg8[%c0_25, %c0_26] : memref<8x1xf32, #tpu.memory_space<vmem>>, vector<8x1xf32>
      tpu.vector_store %arg8[%c0_25, %c0_26], %47 {strides = array<i32>} : memref<8x1xf32, #tpu.memory_space<vmem>>, vector<8x1xf32>,
      %c0_27 = arith.constant 0 : index
      %c0_28 = arith.constant 0 : index
      %49 = vector.load %arg7[%c0_27, %c0_28] : memref<8x1xf32, #tpu.memory_space<vmem>>, vector<8x1xf32>
      tpu.vector_store %arg7[%c0_27, %c0_28], %37 {strides = array<i32>} : memref<8x1xf32, #tpu.memory_space<vmem>>, vector<8x1xf32>,
    } else {
    }
    %c2_i32_11 = arith.constant 2 : i32
    %24 = arith.cmpi eq, %arg1, %c2_i32_11 : i32
    %25 = arith.extui %24 : i1 to i32
    %c0_i32_12 = arith.constant 0 : i32
    %26 = arith.cmpi ne, %25, %c0_i32_12 : i32
    scf.if %26 {
      %c0_13 = arith.constant 0 : index
      %c0_14 = arith.constant 0 : index
      %27 = vector.load %arg9[%c0_13, %c0_14] : memref<8x1xf32, #tpu.memory_space<vmem>>, vector<8x1xf32>
      %c0_15 = arith.constant 0 : index
      %c0_16 = arith.constant 0 : index
      %28 = vector.load %arg7[%c0_15, %c0_16] : memref<8x1xf32, #tpu.memory_space<vmem>>, vector<8x1xf32>
      %c0_17 = arith.constant 0 : index
      %c0_18 = arith.constant 0 : index
      %29 = vector.load %arg8[%c0_17, %c0_18] : memref<8x1xf32, #tpu.memory_space<vmem>>, vector<8x1xf32>
      %30 = math.log %29 : vector<8x1xf32>
      %31 = arith.addf %28, %30 : vector<8x1xf32>
      %32 = arith.subf %27, %31 : vector<8x1xf32>
      %c0_19 = arith.constant 0 : index
      %c0_20 = arith.constant 0 : index
      %33 = vector.load %arg5[%c0_19, %c0_20] : memref<8x1xf32, #tpu.memory_space<vmem>>, vector<8x1xf32>
      tpu.vector_store %arg5[%c0_19, %c0_20], %32 {strides = array<i32>} : memref<8x1xf32, #tpu.memory_space<vmem>>, vector<8x1xf32>,
    } else {
    }
    return
  }
  func.func @transform_0(%arg0: i32, %arg1: i32) -> (i32, i32) {
    %c0_i32 = arith.constant 0 : i32
    %c0_i32_0 = arith.constant 0 : i32
    return %arg0, %c0_i32 : i32, i32
  }
  func.func @transform_1(%arg0: i32, %arg1: i32) -> (i32, i32) {
    %c0_i32 = arith.constant 0 : i32
    %c0_i32_0 = arith.constant 0 : i32
    return %arg1, %c0_i32 : i32, i32
  }
  func.func @transform_2(%arg0: i32, %arg1: i32) -> (i32, i32) {
    %c0_i32 = arith.constant 0 : i32
    %c0_i32_0 = arith.constant 0 : i32
    return %arg0, %c0_i32 : i32, i32
  }
  func.func @transform_3(%arg0: i32, %arg1: i32) -> (i32, i32) {
    %c0_i32 = arith.constant 0 : i32
    %c0_i32_0 = arith.constant 0 : i32
    return %arg0, %c0_i32 : i32, i32
  }
}

</mosaic_0001>

<bundles_post_ra>
// kernel: tpu_custom_call.1
= control target key start
LH: loop header
LB: loop body
LE: loop exit
PB: predicated region body
PF: predicated region fallthrough
CT: control target
= control target key end

     0   :  { %s834_s12 = smov 0   ;;  %s836_s13 = smov 0   ;;  %s969_s0 = inlined_call_operand.vmem [shape: f32[16,64], index: 0, kind: input, shape index: {}]   ;;  %s970_s1 = inlined_call_operand.vmem [shape: f32[320,64], index: 1, kind: input, shape index: {}]   ;;  %s971_s2 = inlined_call_operand.vmem [shape: s32[16,1], index: 2, kind: input, shape index: {}]   ;;  %s972_s3 = inlined_call_operand.vmem [shape: f32[16,1], index: 3, kind: output, shape index: {}]  }
   0x1   :  { %s838_s14 = smov 0   ;;  %s840_s15 = smov 0  }
   0x2   :  { %s842_s16 = smov 0  }
   0x3 LB: > { %s22_s17 = sadd.s32 1, %s796_s14  ;;  %s25_s18 = sadd.s32 1, %s800_s15  ;;  %s804_s16 = sphi %s842_s16, %s13_s16   ;;  %s800_s15 = sphi %s840_s15, %s978_s15   ;;  %s796_s14 = sphi %s838_s14, %s977_s14   ;;  %s792_s13 = sphi %s836_s13, %s976_s13   ;;  %s788_s12 = sphi %s834_s12, %s975_s12  }
   0x4   : > { %p23_p0 = scmp.ge.s32.totalorder %s22_s17, 3  ;;  %p586_p1 = scmp.ge.s32.totalorder %s804_s16, 1 }
   0x5   : > { %p176_p2 = scmp.lt.s32.totalorder %s804_s16, 7 }
   0x6   : > { %s980_s17 = smov (%p23_p0, %s22_s17), 0  ;;  %s982_s18 = smov (!%p23_p0, %s25_s18), %s800_s15 }
   0x7   : > { %p177_p3 = pnand %p586_p1, %p176_p2  ;;  %p27_p4 = scmp.ge.s32.totalorder %s982_s18, 2 }
   0x8   : > { %p211_p5 = scmp.lt.s32.totalorder (!%p177_p3), %s792_s13, 1  ;;  %s588_s19 = sshll.u32 (!%p177_p3), %s788_s12, 4 }
   0x9   : > { %s984_s18 = smov (%p27_p4, %s982_s18), 0  ;;  %180 = sbr.rel (%p177_p3) target bundleno = 1370 (0x55a), region = 32 }
   0xa   : > { %p220_p6 = scmp.lt.s32.totalorder (!%p177_p3), %s588_s19, 39  ;;  %p592_p7 = scmp.ne.s32.totalorder (!%p177_p3), %s788_s12, 0 }
  0x10   : > { %s986_s13 = smov (!%p211_p5, %s792_s13), 1  ;;  %s988_s19 = smov (!%p220_p6, %s588_s19), 39 }
  0x11   : > { %s867_s20 = sshll.u32 %s986_s13, 3  ;;  %s589_s24 = sshll.u32 %s988_s19, 3  ;;  %vm243_vm0 = vcmask (!%p592_p7), 523264   ;;  %vm258_vm1 = vcmask (!%p592_p7), 7168   ;;  %v806_v3 = vmov (!%p592_p7), -1e+30  }
  0x12   : > { %s214_s23 = scalar_lea.vmem %s969_s0, %s867_s20  ;;  %s876_s27 = scalar_lea.vmem %s970_s1, %s589_s24  ;;  %259 = vst.msk [vmem:[#allocation3] sm:$0xff] (!%p592_p7), %vm258_vm1, %v806_v3  ;;  %v807_v4 = vmov (!%p592_p7), 0.0  }
  0x13   : > { %s232_s30 = scalar_lea.vmem %s971_s2, %s867_s20  ;;  %s236_s6 = scalar_lea.vmem %s972_s3, %s867_s20  ;;  %v241_v0 = vld [vmem:[%s214_s23] sm:$0xff] (!%p592_p7)  ;;  %260 = vst.msk [vmem:[#allocation4] sm:$0xff] (!%p592_p7), %vm258_vm1, %v807_v4  ;;  %261 = vst.msk [vmem:[#allocation5] sm:$0xff] (!%p592_p7), %vm258_vm1, %v807_v4 }
  0x14   : > { %240 = sbr.rel (%p592_p7) target bundleno = 196 (0xc4), region = 36  ;;  %v242_v1 = vmul.f32 (!%p592_p7), %v241_v0, %v241_v0 }
  0x16   : > { %v244_v2 = vsel (!%p592_p7), %vm243_vm0, %v242_v1, 0.0 }
  0x17   : > { %245 = vadd.xlane.f32.xlu0 (!%p592_p7), %v244_v2 }
  0xa4   : > { %v246_v5 = vpop.xlane.xlu0 %245 }
  0xa5   : > { %749 = vrsqrt.f32 %v246_v5  ;;  %vm249_vm2 = vcmp.eq.f32.partialorder %v246_v5, inf  ;;  %v252_v8 = vand.u32 2147483648, %v246_v5  ;;  %vm251_vm3 = vcmp.eq.f32.partialorder %v246_v5, 0.0 }
  0xaf   : > { %v750_v6 = vpop.eup %749 }
  0xb0   : > { %v248_v7 = vmul.f32 %v750_v6, %v246_v5 }
  0xb2   : > { %v250_v9 = vsel %vm249_vm2, %v246_v5, %v248_v7 }
  0xb3   : > { %v253_v10 = vsel %vm251_vm3, %v252_v8, %v250_v9 }
  0xb4   : > { %v254_v11 = vmax.f32 %v253_v10, 1e-12 }
  0xb6   : > { %751 = vrcp.f32 %v254_v11 }
  0xc0   : > { %v752_v12 = vpop.eup %751 }
  0xc1   : > { %v256_v13 = vmul.f32 %v752_v12, %v241_v0 }
  0xc3   : > { %257 = vst.msk [vmem:[#allocation2] sm:$0xff] %vm243_vm0, %v256_v13 }
  0xc4 PF: > { %v263_v14 = vld [vmem:[%s876_s27] sm:$0xff]  ;;  %v264_v15 = vld [vmem:[%s876_s27 + $0x8] sm:$0xff]  ;;  %vm279_vm4 = vcmask 523264   ;;  %v808_v16 = vmov 0.0|0.0   ;;  %vm809_vm6 = vmmov 0   ;;  %v810_v19 = vmov 0.0  }
  0xc5   : > { %669 = vmatprep.subr.bf16.mxu0 %v808_v16  ;;  %v670_v17 = vpack.c.bf16 %v264_v15, %v263_v14  ;;  %vm893_vm5 = vmpackc.low %vm279_vm4, %vm279_vm4  ;;  %666 = vmatprep.mubr.msk.f32.mxu0 %vm809_vm6, %v810_v19  ;;  %v811_v20 = vmov 0   ;;  %v265_v21 = vld [vmem:[%s876_s27 + $0x10] sm:$0xff]  ;;  %v266_v22 = vld [vmem:[%s876_s27 + $0x18] sm:$0xff]  ;;  %v403_v44 = vlaneseq  ;;  %s610_s9 = sshll.u32 %s788_s12, 7  ;;  %p612_p8 = scmp.ne.s32.totalorder %s788_s12, 2 }
  0xc6   : > { %753 = vset.pattern.permute.xlu0 %v811_v20  ;;  %v401_v23 = vld [vmem:[%s232_s30] sm:$0xff]  ;;  %v674_v24 = vpack.c.bf16 %v266_v22, %v265_v21  ;;  %v268_v26 = vld [vmem:[%s876_s27 + $0x28] sm:$0xff]  ;;  %v269_v28 = vld [vmem:[%s876_s27 + $0x30] sm:$0xff]  ;;  %v405_v46 = vstv %s610_s9  ;;  %v812_v55 = vmov (!%p612_p8), 0   ;;  %vm425_vm9 = vcmask (!%p612_p8), 7168  }
  0xc7   : > { %672 = vmatpush3.bf16.xpose.msk.msra.mxu0 %vm893_vm5, %v670_v17  ;;  %408 = vperm.xlu0 %753, %v401_v23   ;;  %v267_v25 = vld [vmem:[%s876_s27 + $0x20] sm:$0xff]  ;;  %v270_v29 = vld [vmem:[%s876_s27 + $0x38] sm:$0xff]  ;;  %v272_v32 = vld [vmem:[%s876_s27 + $0x48] sm:$0xff]  ;;  %v404_v45 = vand.u32 127, %v403_v44 }
  0xc8   : > { %673 = vmatprep.subr.bf16.mxu0 %v808_v16  ;;  %v678_v27 = vpack.c.bf16 %v268_v26, %v267_v25  ;;  %v682_v30 = vpack.c.bf16 %v270_v29, %v269_v28  ;;  %v271_v31 = vld [vmem:[%s876_s27 + $0x40] sm:$0xff]  ;;  %v273_v34 = vld [vmem:[%s876_s27 + $0x50] sm:$0xff]  ;;  %v274_v35 = vld [vmem:[%s876_s27 + $0x58] sm:$0xff] }
  0xc9   : > { %v686_v33 = vpack.c.bf16 %v272_v32, %v271_v31  ;;  %v690_v36 = vpack.c.bf16 %v274_v35, %v273_v34  ;;  %v275_v37 = vld [vmem:[%s876_s27 + $0x60] sm:$0xff]  ;;  %v276_v38 = vld [vmem:[%s876_s27 + $0x68] sm:$0xff]  ;;  %v277_v40 = vld [vmem:[%s876_s27 + $0x70] sm:$0xff]  ;;  %v406_v47 = vadd.s32 %v405_v46, %v404_v45 }
  0xca   : > { %v694_v39 = vpack.c.bf16 %v276_v38, %v275_v37  ;;  %v278_v41 = vld [vmem:[%s876_s27 + $0x78] sm:$0xff]  ;;  %v262_v43 = vld [vmem:[#allocation2] sm:$0xff]  ;;  %v427_v56 = vld [vmem:[#allocation3] sm:$0xff] (!%p612_p8) }
  0xcb   : > { %v698_v42 = vpack.c.bf16 %v278_v41, %v277_v40  ;;  %vm418_vm8 = vcmp.lt.s32.totalorder (!%p612_p8), %v406_v47, 320  ;;  %754 = vset.pattern.permute.xlu0 (!%p612_p8), %v812_v55  ;;  %v420_v1 = vld [vmem:[#allocation5] sm:$0xff] (!%p612_p8)  ;;  %v431_v6 = vld [vmem:[#allocation4] sm:$0xff] (!%p612_p8) }
  0xcf   : > { %676 = vmatpush3.bf16.xpose.msk.msra.mxu0 %vm893_vm5, %v674_v24 }
  0xd0   : > { %677 = vmatprep.subr.bf16.mxu0 %v808_v16 }
  0xd7   : > { %680 = vmatpush3.bf16.xpose.msk.msra.mxu0 %vm893_vm5, %v678_v27 }
  0xd8   : > { %681 = vmatprep.subr.bf16.mxu0 %v808_v16 }
  0xdf   : > { %684 = vmatpush3.bf16.xpose.msk.msra.mxu0 %vm893_vm5, %v682_v30 }
  0xe0   : > { %685 = vmatprep.subr.bf16.mxu0 %v808_v16 }
  0xe7   : > { %688 = vmatpush3.bf16.xpose.msk.msra.mxu0 %vm893_vm5, %v686_v33 }
  0xe8   : > { %689 = vmatprep.subr.bf16.mxu0 %v808_v16 }
  0xef   : > { %692 = vmatpush3.bf16.xpose.msk.msra.mxu0 %vm893_vm5, %v690_v36 }
  0xf0   : > { %693 = vmatprep.subr.bf16.mxu0 %v808_v16 }
  0xf7   : > { %696 = vmatpush3.bf16.xpose.msk.msra.mxu0 %vm893_vm5, %v694_v39 }
  0xf8   : > { %697 = vmatprep.subr.bf16.mxu0 %v808_v16 }
  0xff   : > { %700 = vmatpush3.bf16.xpose.msk.msra.mxu0 %vm893_vm5, %v698_v42 }
 0x106   : > { %667 = vmatmul.mubr.msk.f32.vlgmr.msra.gmra.mrb[0].mxu0 %vm279_vm4, %v262_v43 }
 0x146   : > { %v409_v48 = vpop.permute.xlu0 %408 }
 0x147   : > { %vm410_vm7 = vcmp.eq.s32.totalorder %v406_v47, %v409_v48 }
 0x1d8   : > { %417 = sbr.rel (%p612_p8) target bundleno = 912 (0x390), region = 40 }
 0x1d9   : > { %v397_v49 = vpop.f32.mrb[0].mxu0 }
 0x1da   : > { %v411_v50 = vmul.f32 30.0, %v397_v49  ;;  %v668_v51 = vpop.f32.mrb[1].mxu0 }
 0x1dc   : > { %v611_v52 = vadd.f32 -12.0, %v411_v50 }
 0x1de   : > { %v413_v53 = vsel %vm410_vm7, %v611_v52, %v411_v50 }
 0x1df   : > { %v419_v54 = vsel %vm418_vm8, %v413_v53, -1e+30 }
 0x1e0   : > { %428 = vmax.xlane.f32.xlu0 %v419_v54  ;;  %v421_v60 = vsel %vm410_vm7, %v419_v54, 0.0 }
 0x1e1   : > { %422 = vadd.xlane.f32.xlu1 %v421_v60 }
 0x26d   : > { %v429_v57 = vpop.xlane.xlu0 %428 }
 0x26e   : > { %v430_v58 = vmax.f32 %v427_v56, %v429_v57  ;;  %v423_v2 = vpop.xlane.xlu1 %422 }
 0x26f   : > { %v424_v3 = vadd.f32 %v423_v2, %v420_v1 }
 0x270   : > { %v432_v59 = vsub.f32 %v427_v56, %v430_v58  ;;  %448 = vst.msk [vmem:[#allocation3] sm:$0xff] %vm425_vm9, %v430_v58  ;;  %438 = vperm.xlu0 %754, %v430_v58  }
 0x271   : > { %426 = vst.msk [vmem:[#allocation5] sm:$0xff] %vm425_vm9, %v424_v3 }
 0x272   : > { %v433_v4 = vmul.f32 1.442695, %v432_v59 }
 0x2ef   : > { %v439_v61 = vpop.permute.xlu0 %438 }
 0x2f0   : > { %v441_v62 = vsub.f32 %v419_v54, %v439_v61 }
 0x2f2   : > { %v442_v63 = vmul.f32 1.442695, %v441_v62 }
 0x2f4   : > { %755 = vpow2.f32 %v442_v63 }
 0x2f5   : > { %757 = vpow2.f32 %v433_v4 }
 0x2fe   : > { %v756_v0 = vpop.eup %755 }
 0x2ff   : > { %444 = vadd.xlane.f32.xlu1 %v756_v0  ;;  %v758_v5 = vpop.eup %757 }
 0x300   : > { %v435_v7 = vmul.f32 %v758_v5, %v431_v6 }
 0x38c   : > { %v445_v8 = vpop.xlane.xlu1 %444 }
 0x38d   : > { %v446_v9 = vadd.f32 %v445_v8, %v435_v7 }
 0x38f   : > { %447 = vst.msk [vmem:[#allocation4] sm:$0xff] %vm425_vm9, %v446_v9 }
 0x390 PF: > { %p613_p9 = scmp.eq.s32.totalorder %s788_s12, 2 }
 0x391   : > { %461 = vmax.xlane.f32.xlu0 (!%p613_p9), %v413_v53  ;;  %v813_v10 = vmov (!%p613_p9), 0   ;;  %v460_v11 = vld [vmem:[#allocation3] sm:$0xff] (!%p613_p9)  ;;  %vm458_vm10 = vcmask (!%p613_p9), 7168   ;;  %v454_v15 = vsel (!%p613_p9), %vm410_vm7, %v611_v52, 0.0  ;;  %v453_v20 = vld [vmem:[#allocation5] sm:$0xff] (!%p613_p9) }
 0x392   : > { %452 = sbr.rel (%p613_p9) target bundleno = 1345 (0x541), region = 44  ;;  %759 = vset.pattern.permute.xlu0 (!%p613_p9), %v813_v10  ;;  %455 = vadd.xlane.f32.xlu1 (!%p613_p9), %v454_v15 }
 0x396   : > { %v464_v25 = vld [vmem:[#allocation4] sm:$0xff] (!%p613_p9) }
 0x41e   : > { %v462_v12 = vpop.xlane.xlu0 %461 }
 0x41f   : > { %v463_v13 = vmax.f32 %v460_v11, %v462_v12  ;;  %v456_v21 = vpop.xlane.xlu1 %455 }
 0x420   : > { %v457_v22 = vadd.f32 %v456_v21, %v453_v20 }
 0x421   : > { %v465_v14 = vsub.f32 %v460_v11, %v463_v13  ;;  %481 = vst.msk [vmem:[#allocation3] sm:$0xff] %vm458_vm10, %v463_v13  ;;  %471 = vperm.xlu0 %759, %v463_v13  }
 0x422   : > { %459 = vst.msk [vmem:[#allocation5] sm:$0xff] %vm458_vm10, %v457_v22 }
 0x423   : > { %v466_v23 = vmul.f32 1.442695, %v465_v14 }
 0x4a0   : > { %v472_v16 = vpop.permute.xlu0 %471 }
 0x4a1   : > { %v474_v17 = vsub.f32 %v413_v53, %v472_v16 }
 0x4a3   : > { %v475_v18 = vmul.f32 1.442695, %v474_v17 }
 0x4a5   : > { %760 = vpow2.f32 %v475_v18 }
 0x4a6   : > { %762 = vpow2.f32 %v466_v23 }
 0x4af   : > { %v761_v19 = vpop.eup %760 }
 0x4b0   : > { %477 = vadd.xlane.f32.xlu1 %v761_v19  ;;  %v763_v24 = vpop.eup %762 }
 0x4b1   : > { %v468_v26 = vmul.f32 %v763_v24, %v464_v25 }
 0x53d   : > { %v478_v27 = vpop.xlane.xlu1 %477 }
 0x53e   : > { %v479_v28 = vadd.f32 %v478_v27, %v468_v26 }
 0x540   : > { %480 = vst.msk [vmem:[#allocation4] sm:$0xff] %vm458_vm10, %v479_v28 }
 0x541 PF: > { %484 = sbr.rel (%p612_p8) target bundleno = 1370 (0x55a), region = 48  ;;  %v486_v31 = vld [vmem:[#allocation3] sm:$0xff] (!%p612_p8)  ;;  %v485_v33 = vld [vmem:[#allocation5] sm:$0xff] (!%p612_p8)  ;;  %vm492_vm11 = vcmask (!%p612_p8), 7168  }
 0x547   : > { %v487_v29 = vld [vmem:[#allocation4] sm:$0xff] (!%p612_p8) }
 0x548   : > { %764 = vlog2.f32 %v487_v29 }
 0x552   : > { %v765_v30 = vpop.eup %764 }
 0x553   : > { %v489_v32 = vmul.f32 0.6931472, %v765_v30 }
 0x555   : > { %v490_v34 = vadd.f32 %v489_v32, %v486_v31 }
 0x557   : > { %v491_v35 = vsub.f32 %v485_v33, %v490_v34 }
 0x559   : > { %493 = vst.msk [vmem:[%s236_s6] sm:$0xff] %vm492_vm11, %v491_v35 }
 0x55a PF: > { %s13_s16 = sadd.s32 1, %s804_s16   ;;  %s975_s12 = smov %s796_s14 }
 0x55b   : > { %p10_p10 = scmp.ge.s32.totalorder %s13_s16, 8   ;;  %s976_s13 = smov %s800_s15 }
 0x55c   : > { %s977_s14 = smov %s980_s17  ;;  %s978_s15 = smov %s984_s18 }
 0x55d   :  { %12 = sbr.rel (!%p10_p10) target bundleno = 3 (0x3), region = 84 }

</bundles_post_ra>
